<compile_context>
chip_gen: v6e
topology: v6e:2x2x1
jax: 0.10.0
libtpu: 0.0.40
codegen_flags: <defaults>
</compile_context>

<pallas_src>
import functools

import jax
import jax.numpy as jnp
from jax.experimental import pallas as pl
from jax.experimental.pallas import tpu as pltpu


def _freblock_kernel(x_ref, w1_ref, b1_ref, w2_ref, b2_ref, o_ref, *, W, neg_slope):
    x = x_ref[0]                                   # (C, L) in compute dtype
    C = x.shape[0]
    L = x.shape[1]

    # --- Conv2d(nc, nc, kernel_size=1): channel-mixing matmul + bias (f32 acc)
    y = jnp.dot(w1_ref[0], x, preferred_element_type=jnp.float32) + b1_ref[0]
    # --- LeakyReLU(0.1)
    y = jnp.where(y > 0, y, neg_slope * y)
    y = y.astype(x.dtype)

    # --- Conv2d(nc, nc, (1,3), padding=(0,1)):
    # one stacked (3C, C) x (C, L) matmul, then shift the per-tap outputs by
    # +/-1 lane (XLU roll) and zero the columns that would have read padding.
    z = jnp.dot(w2_ref[0], y, preferred_element_type=jnp.float32)   # (3C, L)
    z_m1 = z[0 * C:1 * C]      # tap applied to y[..., w-1]
    z_c = z[1 * C:2 * C]       # center tap
    z_p1 = z[2 * C:3 * C]      # tap applied to y[..., w+1]

    col = jax.lax.broadcasted_iota(jnp.int32, (C, L), 1) % W
    left = jnp.where(col == 0, 0.0, pltpu.roll(z_m1, shift=1, axis=1))
    right = jnp.where(col == W - 1, 0.0, pltpu.roll(z_p1, shift=L - 1, axis=1))

    o_ref[0] = (left + z_c + right + b2_ref[0]).astype(o_ref.dtype)


def _choose_rows_per_tile(rows, W, C, itemsize, target_bytes=4 << 20):
    """Largest per-step row count: whole W-rows, lane-dense, under VMEM budget."""
    if C * rows * W * itemsize <= target_bytes:
        return rows
    best = rows
    for r in range(1, rows):
        if rows % r == 0 and (r * W) % 128 == 0 and C * r * W * itemsize <= target_bytes:
            best = r
    return best


def freblock_cha(x_complex, params, *, compute_dtype=jnp.float32):
    """Pallas implementation of FreBlockCha.forward.

    x_complex: (N, C, H, W) complex64.
    params: {"real": (w1, b1, w2, b2), "imag": (...)} with
        w1: (C, C), b1: (C,), w2: (C, C, 1, 3), b2: (C,).
    compute_dtype: dtype fed to the MXU (use jnp.bfloat16 on v6e/v7x to halve
        HBM traffic; accumulation stays f32).  Default f32 matches PyTorch.
    """
    xr = jnp.real(x_complex)
    xi = jnp.imag(x_complex)
    N, C, H, W = xr.shape
    T = N * H * W

    # (2, N, C, H, W) -> (2, C, N*H*W): channels on sublanes, lane-dense last
    # dim.  Layout plumbing happens in the wrapper (XLA), not in the kernel.
    x_all = jnp.stack([xr, xi], axis=0)
    x_all = jnp.transpose(x_all, (0, 2, 1, 3, 4)).reshape(2, C, T)
    x_all = x_all.astype(compute_dtype)

    def stack_taps(w2):                       # (C, C, 1, 3) -> (3C, C)
        w = w2.reshape(C, C, 3)
        return jnp.transpose(w, (2, 0, 1)).reshape(3 * C, C)

    w1r, b1r, w2r, b2r = params["real"]
    w1i, b1i, w2i, b2i = params["imag"]
    w1_all = jnp.stack([w1r, w1i], axis=0).astype(compute_dtype)               # (2, C, C)
    b1_all = jnp.stack([b1r, b1i], axis=0).reshape(2, C, 1).astype(jnp.float32)
    w2_all = jnp.stack([stack_taps(w2r), stack_taps(w2i)], axis=0).astype(compute_dtype)  # (2, 3C, C)
    b2_all = jnp.stack([b2r, b2i], axis=0).reshape(2, C, 1).astype(jnp.float32)

    rows = N * H
    r_tile = _choose_rows_per_tile(rows, W, C, jnp.dtype(compute_dtype).itemsize)
    L = r_tile * W
    n_l = rows // r_tile

    kernel = functools.partial(_freblock_kernel, W=W, neg_slope=0.1)

    out_all = pl.pallas_call(
        kernel,
        grid=(2, n_l),
        in_specs=[
            pl.BlockSpec((1, C, L), lambda b, l: (b, 0, l)),
            pl.BlockSpec((1, C, C), lambda b, l: (b, 0, 0)),
            pl.BlockSpec((1, C, 1), lambda b, l: (b, 0, 0)),
            pl.BlockSpec((1, 3 * C, C), lambda b, l: (b, 0, 0)),
            pl.BlockSpec((1, C, 1), lambda b, l: (b, 0, 0)),
        ],
        out_specs=pl.BlockSpec((1, C, L), lambda b, l: (b, 0, l)),
        out_shape=jax.ShapeDtypeStruct((2, C, T), jnp.float32),
        compiler_params=pltpu.CompilerParams(
            dimension_semantics=("parallel", "parallel"),
            vmem_limit_bytes=32 * 1024 * 1024,  # explicit; tiles sized to fit v7x's 64 MiB VMEM
        ),
    )(x_all, w1_all, b1_all, w2_all, b2_all)

    out_all = out_all.reshape(2, C, N, H, W)
    out_all = jnp.transpose(out_all, (0, 2, 1, 3, 4))     # (2, N, C, H, W)
    return jax.lax.complex(out_all[0], out_all[1])


# ----------------------------- pure-JAX reference ---------------------------
def _branch_ref(x, w1, b1, w2, b2):
    N, C, H, W = x.shape
    y = jnp.einsum("oi,nihw->nohw", w1, x) + b1[None, :, None, None]
    y = jnp.where(y > 0, y, 0.1 * y)
    yp = jnp.pad(y, ((0, 0), (0, 0), (0, 0), (1, 1)))
    w2r = w2.reshape(C, C, 3)
    out = sum(
        jnp.einsum("oi,nihw->nohw", w2r[:, :, k], yp[:, :, :, k:k + W])
        for k in range(3)
    )
    return out + b2[None, :, None, None]


def freblock_cha_ref(x_complex, params):
    real = _branch_ref(jnp.real(x_complex), *params["real"])
    imag = _branch_ref(jnp.imag(x_complex), *params["imag"])
    return jax.lax.complex(real, imag)


if __name__ == "__main__":
    N, C, H, W = 2, 4, 16, 16
    key = jax.random.PRNGKey(0)
    keys = jax.random.split(key, 10)

    # Deterministic synthetic parameters (Conv2d shapes from __init__).
    def mkp(k0, k1, k2, k3):
        w1 = 0.1 * jax.random.normal(k0, (C, C), jnp.float32)          # 1x1 conv
        b1 = 0.1 * jax.random.normal(k1, (C,), jnp.float32)
        w2 = 0.1 * jax.random.normal(k2, (C, C, 1, 3), jnp.float32)    # (1,3) conv
        b2 = 0.1 * jax.random.normal(k3, (C,), jnp.float32)
        return (w1, b1, w2, b2)

    params = {
        "real": mkp(keys[0], keys[1], keys[2], keys[3]),
        "imag": mkp(keys[4], keys[5], keys[6], keys[7]),
    }

    xr = jax.random.normal(keys[8], (N, C, H, W), jnp.float32)
    xi = jax.random.normal(keys[9], (N, C, H, W), jnp.float32)
    x = jax.lax.complex(xr, xi)   # complex64 input, like torch.complex tensor

    out = jax.block_until_ready(freblock_cha(x, params))
    ref = freblock_cha_ref(x, params)
    assert out.shape == (N, C, H, W) and out.dtype == jnp.complex64
    assert jnp.allclose(out, ref, rtol=1e-4, atol=1e-4)

    print("KERNEL_OK")
</pallas_src>

<mosaic_0001>
module attributes {stable_mosaic.version = 11 : i64} {
  func.func @_freblock_kernel(%arg0: i32, %arg1: i32, %arg2: memref<1x4x512xf32, #tpu.memory_space<vmem>>, %arg3: memref<1x4x4xf32, #tpu.memory_space<vmem>>, %arg4: memref<1x4x1xf32, #tpu.memory_space<vmem>>, %arg5: memref<1x12x4xf32, #tpu.memory_space<vmem>>, %arg6: memref<1x4x1xf32, #tpu.memory_space<vmem>>, %arg7: memref<1x4x512xf32, #tpu.memory_space<vmem>>) attributes {dimension_semantics = [#tpu.dimension_semantics<parallel>, #tpu.dimension_semantics<parallel>], iteration_bounds = array<i64: 2, 1>, scalar_prefetch = 0 : i64, scratch_operands = 0 : i64, tpu.core_type = #tpu.core_type<tc>, window_params = [{transform_indices = @transform_0, window_bounds = array<i64: 1, 4, 512>}, {transform_indices = @transform_1, window_bounds = array<i64: 1, 4, 4>}, {transform_indices = @transform_2, window_bounds = array<i64: 1, 4, 1>}, {transform_indices = @transform_3, window_bounds = array<i64: 1, 12, 4>}, {transform_indices = @transform_4, window_bounds = array<i64: 1, 4, 1>}, {transform_indices = @transform_5, window_bounds = array<i64: 1, 4, 512>}]} {
    %c0 = arith.constant 0 : index
    %c0_0 = arith.constant 0 : index
    %c0_1 = arith.constant 0 : index
    %0 = vector.load %arg2[%c0, %c0_0, %c0_1] : memref<1x4x512xf32, #tpu.memory_space<vmem>>, vector<1x4x512xf32>
    %1 = vector.shape_cast %0 : vector<1x4x512xf32> to vector<4x512xf32>
    %c0_2 = arith.constant 0 : index
    %c0_3 = arith.constant 0 : index
    %c0_4 = arith.constant 0 : index
    %2 = vector.load %arg3[%c0_2, %c0_3, %c0_4] : memref<1x4x4xf32, #tpu.memory_space<vmem>>, vector<1x4x4xf32>
    %3 = vector.shape_cast %2 : vector<1x4x4xf32> to vector<4x4xf32>
    %cst = arith.constant dense<0.000000e+00> : vector<4x512xf32>
    %4 = tpu.matmul %3, %1, %cst {dimension_numbers = #tpu.dot_dimension_numbers<[1], [0], [0], [1], [0, 0, 1, 1], [], []>} : vector<4x4xf32>, vector<4x512xf32>, vector<4x512xf32> -> vector<4x512xf32>
    %c0_5 = arith.constant 0 : index
    %c0_6 = arith.constant 0 : index
    %c0_7 = arith.constant 0 : index
    %5 = vector.load %arg4[%c0_5, %c0_6, %c0_7] : memref<1x4x1xf32, #tpu.memory_space<vmem>>, vector<1x4x1xf32>
    %6 = vector.shape_cast %5 : vector<1x4x1xf32> to vector<4x1xf32>
    %7 = vector.broadcast %6 : vector<4x1xf32> to vector<4x512xf32>
    %8 = arith.addf %4, %7 : vector<4x512xf32>
    %cst_8 = arith.constant 0.000000e+00 : f32
    %9 = vector.broadcast %cst_8 : f32 to vector<4x512xf32>
    %10 = arith.cmpf ogt, %8, %9 : vector<4x512xf32>
    %cst_9 = arith.constant 1.000000e-01 : f32
    %11 = vector.broadcast %cst_9 : f32 to vector<4x512xf32>
    %12 = arith.mulf %11, %8 : vector<4x512xf32>
    %13 = arith.select %10, %8, %12 : vector<4x512xi1>, vector<4x512xf32>
    %c0_10 = arith.constant 0 : index
    %c0_11 = arith.constant 0 : index
    %c0_12 = arith.constant 0 : index
    %14 = vector.load %arg5[%c0_10, %c0_11, %c0_12] : memref<1x12x4xf32, #tpu.memory_space<vmem>>, vector<1x12x4xf32>
    %15 = vector.shape_cast %14 : vector<1x12x4xf32> to vector<12x4xf32>
    %cst_13 = arith.constant dense<0.000000e+00> : vector<12x512xf32>
    %16 = tpu.matmul %15, %13, %cst_13 {dimension_numbers = #tpu.dot_dimension_numbers<[1], [0], [0], [1], [0, 0, 1, 1], [], []>} : vector<12x4xf32>, vector<4x512xf32>, vector<12x512xf32> -> vector<12x512xf32>
    %17 = vector.extract_strided_slice %16 {offsets = [0, 0], sizes = [4, 512], strides = [1, 1]} : vector<12x512xf32> to vector<4x512xf32>
    %18 = vector.extract_strided_slice %16 {offsets = [4, 0], sizes = [4, 512], strides = [1, 1]} : vector<12x512xf32> to vector<4x512xf32>
    %19 = vector.extract_strided_slice %16 {offsets = [8, 0], sizes = [4, 512], strides = [1, 1]} : vector<12x512xf32> to vector<4x512xf32>
    %20 = tpu.iota {dimensions = array<i32: 1>} : vector<4x512xi32>
    %c16_i32 = arith.constant 16 : i32
    %c0_i32 = arith.constant 0 : i32
    %21 = arith.cmpi eq, %c16_i32, %c0_i32 : i32
    %c1_i32 = arith.constant 1 : i32
    %22 = arith.select %21, %c1_i32, %c16_i32 : i32
    %23 = vector.broadcast %22 : i32 to vector<4x512xi32>
    %24 = arith.remsi %20, %23 : vector<4x512xi32>
    %c0_i32_14 = arith.constant 0 : i32
    %25 = vector.broadcast %c0_i32_14 : i32 to vector<4x512xi32>
    %26 = arith.cmpi ne, %24, %25 : vector<4x512xi32>
    %c0_i32_15 = arith.constant 0 : i32
    %27 = vector.broadcast %c0_i32_15 : i32 to vector<4x512xi32>
    %28 = arith.cmpi slt, %24, %27 : vector<4x512xi32>
    %c0_i32_16 = arith.constant 0 : i32
    %29 = arith.cmpi slt, %22, %c0_i32_16 : i32
    %30 = vector.broadcast %29 : i1 to vector<4x512xi1>
    %31 = vector.broadcast %30 : vector<4x512xi1> to vector<4x512xi1>
    %32 = arith.xori %28, %31 : vector<4x512xi1>
    %33 = arith.andi %32, %26 : vector<4x512xi1>
    %34 = vector.broadcast %22 : i32 to vector<4x512xi32>
    %35 = arith.addi %24, %34 : vector<4x512xi32>
    %36 = arith.select %33, %35, %24 : vector<4x512xi1>, vector<4x512xi32>
    %c0_i32_17 = arith.constant 0 : i32
    %37 = vector.broadcast %c0_i32_17 : i32 to vector<4x512xi32>
    %38 = arith.cmpi eq, %36, %37 : vector<4x512xi32>
    %c1_i32_18 = arith.constant 1 : i32
    %39 = tpu.dynamic_rotate %17 by %c1_i32_18 dim 1 : vector<4x512xf32>, i32 -> vector<4x512xf32>
    %cst_19 = arith.constant 0.000000e+00 : f32
    %40 = vector.broadcast %cst_19 : f32 to vector<4x512xf32>
    %41 = arith.select %38, %40, %39 : vector<4x512xi1>, vector<4x512xf32>
    %c15_i32 = arith.constant 15 : i32
    %42 = vector.broadcast %c15_i32 : i32 to vector<4x512xi32>
    %43 = arith.cmpi eq, %36, %42 : vector<4x512xi32>
    %c511_i32 = arith.constant 511 : i32
    %44 = tpu.dynamic_rotate %19 by %c511_i32 dim 1 : vector<4x512xf32>, i32 -> vector<4x512xf32>
    %cst_20 = arith.constant 0.000000e+00 : f32
    %45 = vector.broadcast %cst_20 : f32 to vector<4x512xf32>
    %46 = arith.select %43, %45, %44 : vector<4x512xi1>, vector<4x512xf32>
    %47 = arith.addf %41, %18 : vector<4x512xf32>
    %48 = arith.addf %47, %46 : vector<4x512xf32>
    %c0_21 = arith.constant 0 : index
    %c0_22 = arith.constant 0 : index
    %c0_23 = arith.constant 0 : index
    %49 = vector.load %arg6[%c0_21, %c0_22, %c0_23] : memref<1x4x1xf32, #tpu.memory_space<vmem>>, vector<1x4x1xf32>
    %50 = vector.shape_cast %49 : vector<1x4x1xf32> to vector<4x1xf32>
    %51 = vector.broadcast %50 : vector<4x1xf32> to vector<4x512xf32>
    %52 = arith.addf %48, %51 : vector<4x512xf32>
    %c0_24 = arith.constant 0 : index
    %c0_25 = arith.constant 0 : index
    %c0_26 = arith.constant 0 : index
    %53 = vector.load %arg7[%c0_24, %c0_25, %c0_26] : memref<1x4x512xf32, #tpu.memory_space<vmem>>, vector<1x4x512xf32>
    %54 = vector.shape_cast %53 : vector<1x4x512xf32> to vector<4x512xf32>
    %55 = vector.shape_cast %52 : vector<4x512xf32> to vector<1x4x512xf32>
    tpu.vector_store %arg7[%c0_24, %c0_25, %c0_26], %55 {strides = array<i32>} : memref<1x4x512xf32, #tpu.memory_space<vmem>>, vector<1x4x512xf32>,
    return
  }
  func.func @transform_0(%arg0: i32, %arg1: i32) -> (i32, i32, i32) {
    %c0_i32 = arith.constant 0 : i32
    %c0_i32_0 = arith.constant 0 : i32
    return %arg0, %c0_i32, %arg1 : i32, i32, i32
  }
  func.func @transform_1(%arg0: i32, %arg1: i32) -> (i32, i32, i32) {
    %c0_i32 = arith.constant 0 : i32
    %c0_i32_0 = arith.constant 0 : i32
    %c0_i32_1 = arith.constant 0 : i32
    return %arg0, %c0_i32, %c0_i32_0 : i32, i32, i32
  }
  func.func @transform_2(%arg0: i32, %arg1: i32) -> (i32, i32, i32) {
    %c0_i32 = arith.constant 0 : i32
    %c0_i32_0 = arith.constant 0 : i32
    %c0_i32_1 = arith.constant 0 : i32
    return %arg0, %c0_i32, %c0_i32_0 : i32, i32, i32
  }
  func.func @transform_3(%arg0: i32, %arg1: i32) -> (i32, i32, i32) {
    %c0_i32 = arith.constant 0 : i32
    %c0_i32_0 = arith.constant 0 : i32
    %c0_i32_1 = arith.constant 0 : i32
    return %arg0, %c0_i32, %c0_i32_0 : i32, i32, i32
  }
  func.func @transform_4(%arg0: i32, %arg1: i32) -> (i32, i32, i32) {
    %c0_i32 = arith.constant 0 : i32
    %c0_i32_0 = arith.constant 0 : i32
    %c0_i32_1 = arith.constant 0 : i32
    return %arg0, %c0_i32, %c0_i32_0 : i32, i32, i32
  }
  func.func @transform_5(%arg0: i32, %arg1: i32) -> (i32, i32, i32) {
    %c0_i32 = arith.constant 0 : i32
    %c0_i32_0 = arith.constant 0 : i32
    return %arg0, %c0_i32, %arg1 : i32, i32, i32
  }
}

</mosaic_0001>

<bundles_post_ra>
// kernel: tpu_custom_call.1
= control target key start
LH: loop header
LB: loop body
LE: loop exit
PB: predicated region body
PF: predicated region fallthrough
CT: control target
= control target key end

     0   :  { %10 = vsyncpa [#allocation3], 0  ;;  %s1347_s0 = inlined_call_operand.vmem [shape: f32[2,4,512], index: 0, kind: input, shape index: {}]   ;;  %s1348_s1 = inlined_call_operand.vmem [shape: f32[2,4,4], index: 1, kind: input, shape index: {}]   ;;  %s1349_s2 = inlined_call_operand.vmem [shape: f32[2,4,1], index: 2, kind: input, shape index: {}]   ;;  %s1350_s3 = inlined_call_operand.vmem [shape: f32[2,12,4], index: 3, kind: input, shape index: {}]   ;;  %s1351_s4 = inlined_call_operand.vmem [shape: f32[2,4,1], index: 4, kind: input, shape index: {}]   ;;  %s1352_s5 = inlined_call_operand.hbm [shape: f32[2,4,512], index: 5, kind: output, shape index: {}]  }
   0x1   :  { %12 = vsyncpa [#allocation3 + $0x1], 0  ;;  %s1166_s18 = smov 0   ;;  %s1168_s19 = smov 0  }
   0x2   :  { %s1170_s20 = smov 0   ;;  %s1172_s21 = smov 0  }
   0x3   :  { %s1174_s22 = smov 0   ;;  %s1176_s23 = smov 0  }
   0x4 LB: > { %s955_s24 = sadd.s32 4294967295, %s1129_s23   ;;  %s956_s25 = sadd.s32 4294967294, %s1129_s23   ;;  %s1129_s23 = sphi %s1176_s23, %s18_s23   ;;  %s1125_s22 = sphi %s1174_s22, %s1369_s22   ;;  %s1121_s21 = sphi %s1172_s21, %s1368_s21   ;;  %s1117_s20 = sphi %s1170_s20, %s1367_s20   ;;  %s1113_s19 = sphi %s1168_s19, %s1366_s19   ;;  %s1109_s18 = sphi %s1166_s18, %s1365_s18  }
   0x5   : > { %s30_s26 = sadd.s32 1, %s1125_s22  ;;  %s171_s27 = sadd.s32 1, %s1117_s20 }
   0x6   : > { %p32_p0 = scmp.ge.s32.totalorder %s30_s26, 2  ;;  %p181_p1 = scmp.ne.s32.totalorder %s1117_s20, %s1113_s19 }
   0x7   : > { %p182_p2 = scmp.eq.s32.totalorder %s955_s24, 1  ;;  %p187_p3 = scmp.ne.s32.totalorder %s1113_s19, %s1109_s18 }
   0x8   : > { %s1371_s26 = smov (%p32_p0, %s30_s26), 0  ;;  %p188_p5 = scmp.eq.s32.totalorder %s956_s25, 1 }
   0x9   : > { %p1206_p4 = por %p182_p2, %p181_p1  ;;  %s166_s29 = ssub.s32 %s1125_s22, %s1371_s26 }
   0xa   : > { %p959_p6 = scmp.ge.s32.totalorder %s1129_s23, 1  ;;  %p169_p7 = scmp.eq.s32.totalorder %s166_s29, 0 }
   0xb   : > { %p1213_p8 = por %p188_p5, %p187_p3  ;;  %p248_p9 = scmp.lt.s32.totalorder %s1129_s23, 3 }
   0xc   : > { %s1219_s6 = scalar_select %p169_p7, %s1117_s20, %s171_s27  }
   0xd   : > { %p249_p10 = pnand %p959_p6, %p248_p9 }
   0xe   : > { %p298_p11 = scmp.lt.s32.totalorder (!%p249_p10), %s1121_s21, 1  ;;  %s989_s14 = sshll.u32 (!%p249_p10), %s1121_s21, 8 }
   0xf   : > { %252 = sbr.rel (%p249_p10) target bundleno = 572 (0x23c), region = 40  ;;  %s1305_s25 = scalar_lea.hbm (!%p249_p10), %s1352_s5, %s989_s14 }
  0x14   : > { %v1131_v0 = vmov 0.0   ;;  %s1223_s7 = scalar_select %p298_p11, %s1121_s21, 1  ;;  %v1132_v1 = vmov 0   ;;  %vm342_vm0 = vcmask 1043456   ;;  %vm338_vm1 = vcmask 31744  }
  0x15   : > { %415 = vmatprep.mubr.f32.mxu0 %v1131_v0  ;;  %486 = vmatprep.mubr.f32.mxu1 %v1131_v0  ;;  %v679_v36 = vlaneseq }
  0x16   : > { %1049 = vset.pattern.permute.xlu0 %v1132_v1  ;;  %1050 = vset.pattern.permute.xlu1 %v1132_v1  ;;  %s987_s8 = sshll.u32 %s1223_s7, 4  ;;  %s963_s9 = sshll.u32 %s1223_s7, 2 }
  0x17   : > { %s305_s12 = scalar_lea.vmem %s1347_s0, %s987_s8  ;;  %s310_s15 = scalar_lea.vmem %s1348_s1, %s963_s9  ;;  %v680_v37 = vand.u32 127, %v679_v36 }
  0x18   : > { %v325_v2 = vld [vmem:[%s305_s12] sm:$0xff]  ;;  %v326_v3 = vld [vmem:[%s305_s12 + $0x8] sm:$0xff]  ;;  %s314_s24 = scalar_lea.vmem %s1349_s2, %s963_s9  ;;  %s323_s29 = scalar_lea.vmem %s1351_s4, %s963_s9 }
  0x19   : > { %v336_v4 = vcombine.high %v325_v2, %v325_v2  ;;  %v337_v5 = vcombine.high %v326_v3, %v326_v3  ;;  %v328_v6 = vld [vmem:[%s314_s24] sm:$0xf]  ;;  %s319_s12 = scalar_lea.vmem %s1350_s3, %s987_s8  ;;  %s1133_s7 = smov 1   ;;  %v683_v39 = vadd.s32 384, %v680_v37  ;;  %v681_v40 = vadd.s32 128, %v680_v37 }
  0x1a   : > { %v327_v7 = vld [vmem:[%s310_s15] sm:$0xf]  ;;  %331 = vperm.xlu0 %1049, %v328_v6   ;;  %v506_v27 = vld [vmem:[%s319_s12 + $0x8] sm:$0xf]  ;;  %s1134_s8 = smov 127   ;;  %v682_v41 = vadd.s32 256, %v680_v37 }
  0x1b   : > { %968 = vmatprep.subr.msk.mxu0 %vm342_vm0, %v336_v4  ;;  %971 = vmatprep.subr.msk.mxu1 %vm342_vm0, %v337_v5  ;;  %v794_v8 = vld [vmem:[%s323_s29] sm:$0xf]  ;;  %v688_v44 = vand.u32 15, %v680_v37  ;;  %v709_v45 = vand.u32 15, %v683_v39  ;;  %v695_v46 = vand.u32 15, %v681_v40  ;;  %vm744_vm6 = vcmp.lt.s32.totalorder %v680_v37, 1 }
  0x1c   : > { %969 = vmatpush1.msk.msra.mxu0 %vm342_vm0, %v325_v2  ;;  %972 = vmatpush1.msk.msra.mxu1 %vm342_vm0, %v326_v3  ;;  %v505_v24 = vld [vmem:[%s319_s12] sm:$0xff]  ;;  %v702_v47 = vand.u32 15, %v682_v41  ;;  %vm765_vm11 = vcmp.lt.s32.totalorder %v680_v37, 127  ;;  %s294_s9 = sand.u32 1, %s1113_s19   ;;  %s1135_s29 = smov [#allocation2]  }
  0x1d   : > { %970 = vmatmul.mubr.msk.f32.vlgmr.msra.gmra.mxu0 %vm338_vm1, %v327_v7  ;;  %973 = vmatmul.mubr.msk.f32.vlgmr.msra.gmra.mxu1 %vm338_vm1, %v327_v7  ;;  %vm1263_vm7 = vcmp.eq.s32.totalorder %v688_v44, 0  ;;  %vm1267_vm8 = vcmp.eq.s32.totalorder %v709_v45, 0  ;;  %vm1271_vm9 = vcmp.eq.s32.totalorder %v695_v46, 0  ;;  %vm1279_vm12 = vcmp.eq.s32.totalorder %v688_v44, 15  ;;  %s960_s13 = sshll.u32 %s294_s9, 4  ;;  %s815_s27 = scalar_lea.sflag [#allocation3], %s294_s9 }
  0x1e   : > { %589 = vmatprep.mubr.f32.mxu0 %v1131_v0  ;;  %666 = vmatprep.mubr.f32.mxu1 %v1131_v0  ;;  %vm1275_vm10 = vcmp.eq.s32.totalorder %v702_v47, 0  ;;  %vm754_vm13 = vcmp.eq.s32.totalorder %v695_v46, 15  ;;  %vm755_vm14 = vcmp.eq.s32.totalorder %v702_v47, 15  ;;  %vm756_vm15 = vcmp.eq.s32.totalorder %v709_v45, 15  ;;  %s296_s15 = scalar_lea.vmem [#allocation2], %s960_s13  ;;  %s1057_s10 = sshll.u32 %s1135_s29, 4  ;;  %s1058_s10 = int_to_ptr.vmem [resolvable:$false] %s1057_s10 }
  0x1f   : > { %797 = vperm.xlu1 %1050, %v794_v8   ;;  %s831_s16 = sshll.u32 %s296_s15, 4  ;;  %s1059_s11 = scalar_lea.vmem %s1058_s10, 512  ;;  %s832_s16 = int_to_ptr.vmem [resolvable:$true] %s831_s16 }
  0x20   : > { %s1053_s21 = scalar_lea.vmem %s832_s16, 256  ;;  %p1060_p1 = scmp.lt.s32.totalorder %s832_s16, %s1058_s10 }
  0x21   : > { %p1054_p12 = scmp.ne.s32.totalorder %s832_s16, %s1053_s21  ;;  %p1061_p2 = scmp.lt.s32.totalorder %s1059_s11, %s1053_s21 }
  0x23   : > { %p1055_p13 = pnand %p1054_p12, %p1206_p4  ;;  %p1062_p3 = por %p1061_p2, %p1060_p1 }
  0x25   : > { %p1056_p0 = pneg %p1055_p13 }
  0x27   : > { %p1063_p5 = pnand %p1062_p3, %p1056_p0 }
  0x95   : > { %v332_v9 = vpop.permute.xlu0 %331 }
  0x9a   : > { %v798_v38 = vpop.permute.xlu1 %797 }
  0xdd   : > { %v417_v10 = vpop.f32.mrf.mxu0  ;;  %v488_v11 = vpop.f32.mrf.mxu1 }
  0xde   : > { %v418_v12 = vadd.f32 %v417_v10, %v332_v9  ;;  %v489_v13 = vadd.f32 %v488_v11, %v332_v9 }
  0xdf   : > { %v419_v14 = vpop.f32.mrf.mxu0  ;;  %v490_v15 = vpop.f32.mrf.mxu1 }
  0xe0   : > { %v420_v16 = vadd.f32 %v419_v14, %v332_v9  ;;  %v491_v17 = vadd.f32 %v490_v15, %v332_v9  ;;  %vm493_vm2 = vcmp.gt.f32.partialorder %v418_v12, 0.0  ;;  %v497_v18 = vmul.f32 0.1, %v418_v12 }
  0xe1   : > { %vm495_vm3 = vcmp.gt.f32.partialorder %v489_v13, 0.0  ;;  %v499_v19 = vmul.f32 0.1, %v489_v13 }
  0xe2   : > { %vm494_vm4 = vcmp.gt.f32.partialorder %v420_v16, 0.0  ;;  %v498_v20 = vmul.f32 0.1, %v420_v16  ;;  %vm496_vm5 = vcmp.gt.f32.partialorder %v491_v17, 0.0  ;;  %v500_v21 = vmul.f32 0.1, %v491_v17 }
  0xe3   : > { %v501_v25 = vsel %vm493_vm2, %v418_v12, %v497_v18  ;;  %v503_v26 = vsel %vm495_vm3, %v489_v13, %v499_v19 }
  0xe4   : > { %v502_v22 = vsel %vm494_vm4, %v420_v16, %v498_v20  ;;  %v504_v23 = vsel %vm496_vm5, %v491_v17, %v500_v21 }
  0xe5   : > { %974 = vmatprep.subr.msk.mxu0 %vm342_vm0, %v502_v22  ;;  %978 = vmatprep.subr.msk.mxu1 %vm342_vm0, %v504_v23 }
  0xe6   : > { %975 = vmatpush1.msk.msra.mxu0 %vm342_vm0, %v501_v25  ;;  %979 = vmatpush1.msk.msra.mxu1 %vm342_vm0, %v503_v26 }
  0xe7   : > { %976 = vmatmul.mubr.msk.f32.vlgmr.msra.gmra.mxu0 %vm338_vm1, %v505_v24  ;;  %980 = vmatmul.mubr.msk.f32.vlgmr.msra.gmra.mxu1 %vm338_vm1, %v505_v24 }
  0xe8   : > { %595 = vmatprep.mubr.f32.mxu0 %v1131_v0  ;;  %672 = vmatprep.mubr.f32.mxu1 %v1131_v0 }
  0xeb   : > { %977 = vmatmul.mubr.msk.f32.gmra.mxu0 %vm338_vm1, %v506_v27  ;;  %981 = vmatmul.mubr.msk.f32.gmra.mxu1 %vm338_vm1, %v506_v27 }
 0x1a7   : > { %v591_v28 = vpop.f32.mrf.mxu0  ;;  %v1260_v29 = vpop.f32.mrf.mxu1 }
 0x1a8   : > { %740 = vrot.lane.b32.xlu1 %v1260_v29, %s1133_s7  ;;  %736 = vrot.lane.b32.xlu0 %v591_v28, %s1133_s7  ;;  %v778_v59 = vrot.slane %v591_v28, 4  ;;  %v780_v3 = vrot.slane %v1260_v29, 4 }
 0x1a9   : > { %v593_v30 = vpop.f32.mrf.mxu0  ;;  %v670_v31 = vpop.f32.mrf.mxu1 }
 0x1aa   : > { %v779_v4 = vrot.slane %v593_v30, 4  ;;  %v781_v5 = vrot.slane %v670_v31, 4 }
 0x1ab   : > { %v597_v32 = vpop.f32.mrf.mxu0  ;;  %v674_v34 = vpop.f32.mrf.mxu1 }
 0x1ac   : > { %742 = vrot.lane.b32.xlu0 %v670_v31, %s1133_s7  ;;  %738 = vrot.lane.b32.xlu1 %v593_v30, %s1133_s7 }
 0x1ad   : > { %v599_v33 = vpop.f32.mrf.mxu0  ;;  %v676_v35 = vpop.f32.mrf.mxu1 }
 0x1b0   : > { %757 = vrot.lane.b32.xlu0 %v597_v32, %s1134_s8  ;;  %759 = vrot.lane.b32.xlu1 %v599_v33, %s1134_s8 }
 0x1b4   : > { %761 = vrot.lane.b32.xlu0 %v674_v34, %s1134_s8  ;;  %763 = vrot.lane.b32.xlu1 %v676_v35, %s1134_s8 }
 0x21a   : > { %v741_v42 = vpop.permute.xlu1 %740  ;;  %v737_v43 = vpop.permute.xlu0 %736 }
 0x21e   : > { %v743_v49 = vpop.permute.xlu0 %742  ;;  %v739_v50 = vpop.permute.xlu1 %738 }
 0x21f   : > { %v748_v52 = vsel %vm744_vm6, %v743_v49, %v737_v43  ;;  %v745_v55 = vsel %vm744_vm6, %v741_v42, %v743_v49  ;;  %v746_v56 = vsel %vm744_vm6, %v739_v50, %v741_v42  ;;  %v747_v57 = vsel %vm744_vm6, %v737_v43, %v739_v50 }
 0x220   : > { %v749_v60 = vsel %vm1263_vm7, 0.0, %v748_v52  ;;  %v752_v63 = vsel %vm1267_vm8, 0.0, %v745_v55  ;;  %v750_v0 = vsel %vm1271_vm9, 0.0, %v747_v57  ;;  %v751_v1 = vsel %vm1275_vm10, 0.0, %v746_v56 }
 0x221   : > { %v786_v7 = vadd.f32 %v778_v59, %v749_v60  ;;  %v789_v8 = vadd.f32 %v781_v5, %v752_v63  ;;  %v787_v9 = vadd.f32 %v779_v4, %v750_v0  ;;  %v788_v10 = vadd.f32 %v780_v3, %v751_v1 }
 0x222   : > { %v758_v61 = vpop.permute.xlu0 %757  ;;  %v760_v62 = vpop.permute.xlu1 %759 }
 0x223   : > { %v768_v2 = vsel %vm765_vm11, %v758_v61, %v760_v62 }
 0x224   : > { %v770_v6 = vsel %vm1279_vm12, 0.0, %v768_v2 }
 0x225   : > { %v790_v13 = vadd.f32 %v786_v7, %v770_v6 }
 0x226   : > { %v762_v11 = vpop.permute.xlu0 %761  ;;  %v764_v12 = vpop.permute.xlu1 %763 }
 0x227   : > { %v767_v14 = vsel %vm765_vm11, %v760_v62, %v762_v11  ;;  %v766_v15 = vsel %vm765_vm11, %v762_v11, %v764_v12  ;;  %v769_v16 = vsel %vm765_vm11, %v764_v12, %v758_v61  ;;  %v800_v23 = vadd.f32 %v798_v38, %v790_v13 }
 0x228   : > { %v771_v17 = vsel %vm754_vm13, 0.0, %v767_v14  ;;  %v772_v18 = vsel %vm755_vm14, 0.0, %v766_v15  ;;  %v773_v19 = vsel %vm756_vm15, 0.0, %v769_v16 }
 0x229   : > { %v791_v20 = vadd.f32 %v787_v9, %v771_v17  ;;  %v792_v21 = vadd.f32 %v788_v10, %v772_v18  ;;  %v793_v22 = vadd.f32 %v789_v8, %v773_v19 }
 0x22b   : > { %v801_v24 = vadd.f32 %v798_v38, %v791_v20  ;;  %v802_v25 = vadd.f32 %v798_v38, %v792_v21  ;;  %v803_v26 = vadd.f32 %v798_v38, %v793_v22 }
 0x22d   : > { %v808_v27 = vcombine.low %v800_v23, %v801_v24  ;;  %v809_v28 = vcombine.low %v802_v25, %v803_v26 }
 0x22f   : > { %812 = vst [vmem:[%s296_s15] sm:$0xff] %v808_v27  ;;  %813 = vst [vmem:[%s296_s15 + $0x8] sm:$0xff] %v809_v28 }
 0x230   : > { %1066 = shalt.err (!%p1063_p5)
}
 0x231   : > { %s1067_s12 = scalar_lea.hbm %s1305_s25, 256  ;;  %s1071_s9 = scalar_lea.hbm %s1352_s5, 512 }
 0x232   : > { %p1068_p6 = scmp.ne.s32.totalorder %s1305_s25, %s1067_s12  ;;  %p1072_p10 = scmp.lt.s32.totalorder %s1305_s25, %s1352_s5 }
 0x233   : > { %p1073_p11 = scmp.lt.s32.totalorder %s1071_s9, %s1067_s12 }
 0x234   : > { %p1069_p7 = pnand %p1068_p6, %p1206_p4 }
 0x235   : > { %p1074_p12 = por %p1073_p11, %p1072_p10 }
 0x236   : > { %p1070_p9 = pneg %p1069_p7 }
 0x238   : > { %p1075_p13 = pnand %p1074_p12, %p1070_p9 }
 0x23a   : > { %1078 = shalt.err (!%p1075_p13)
}
 0x23b   : > { %990 = dma.vmem_to_hbm [thread:$0]  (%p1206_p4), %s832_s16, 256, %s1305_s25, %s815_s27  }
 0x23c PF: > { %p996_p0 = scmp.ge.s32.totalorder %s1129_s23, 2  ;;  %s843_s15 = sand.u32 1, %s1109_s18  }
 0x23d   : > { %s844_s17 = scalar_lea.sflag [#allocation3], %s843_s15 }
 0x23e   : > { %p993_p1 = pnand %p996_p0, %p1213_p8 }
 0x240   : > { %p994_p2 = pneg %p993_p1 }
 0x242   : > { %1104 = dma.done.wait (%p994_p2), %s844_s17, 256  }
 0x243   : > { %1106 = vsyncadd (%p994_p2), %s844_s17, 4294967040  ;;  %s18_s23 = sadd.s32 1, %s1129_s23   ;;  %s1365_s18 = smov %s1113_s19 }
 0x244   : > { %p15_p3 = scmp.ge.s32.totalorder %s18_s23, 4   ;;  %s1366_s19 = smov %s1117_s20 }
 0x245   : > { %s1367_s20 = smov %s1219_s6  ;;  %s1368_s21 = smov %s1125_s22 }
 0x246   : > { %s1369_s22 = smov %s1371_s26  ;;  %17 = sbr.rel (!%p15_p3) target bundleno = 4 (0x4), region = 87 }
 0x24b   :  { %849 = vsyncpa [#allocation3], 1 }
 0x24c   :  { %851 = vsyncpa [#allocation3 + $0x1], 1 }

</bundles_post_ra>
